<compile_context>
chip_gen: v7x
topology: tpu7x:2x2x1
jax: 0.10.0
libtpu: 0.0.40
codegen_flags: <defaults>
</compile_context>

<pallas_src>
import functools

import jax
import jax.numpy as jnp
from jax import lax
from jax.experimental import pallas as pl
from jax.experimental.pallas import tpu as pltpu

_LANES = 128
_SUBLANES = 8
_TARGET_BLOCK_BYTES = 1 << 20      # ~1 MiB per input block (safe on v5e/v6e/v7x)
_MAX_TILE_ROWS = 2048
_VMEM_LIMIT_BYTES = 32 * 1024 * 1024


def _round_up(a, b):
    return (a + b - 1) // b * b


def _choose_tile_rows(total_rows, row_bytes):
    """Pick (tile_rows, padded_rows): tile_rows is a multiple of 8, <= 2048,
    sized so tile_rows*row_bytes ~= 1 MiB; padded_rows is a multiple of tile_rows."""
    tr = _TARGET_BLOCK_BYTES // max(row_bytes, 1)
    tr = max(_SUBLANES, min(_MAX_TILE_ROWS, (tr // _SUBLANES) * _SUBLANES))
    padded = _round_up(total_rows, _SUBLANES)
    if padded <= tr:
        return padded, padded          # single block covering the whole (padded) array
    padded = _round_up(padded, tr)
    return tr, padded


def _layernorm_lane_dense_kernel(x_ref, g_ref, p_ref, o_ref, *, eps):
    """Lane-dense LayerNorm: each 128-lane row packs G = 128//feats logical rows.

    p_ref is a (128, 128) block-diagonal matrix with 1/feats inside each
    feats x feats diagonal block, so `x @ p` yields the per-segment mean already
    broadcast back to every lane of its segment (MXU does the cross-lane work).
    """
    x = x_ref[...].astype(jnp.float32)                        # (tile_rows, 128)
    p = p_ref[...]                                            # (128, 128) f32
    mean = jnp.dot(x, p, preferred_element_type=jnp.float32)  # segment mean per lane
    xc = x - mean
    var = jnp.dot(xc * xc, p, preferred_element_type=jnp.float32)  # biased variance
    scale = lax.rsqrt(var + eps) * g_ref[...].astype(jnp.float32)  # fused affine
    o_ref[...] = (xc * scale).astype(o_ref.dtype)


def _layernorm_rowwise_kernel(x_ref, g_ref, o_ref, *, stable, eps):
    """General path: normalize over the full last dim of the block."""
    x = x_ref[...].astype(jnp.float32)                        # (tile_rows, feats)
    if stable:
        # Matches torch: divides by the (signed) row max, no zero guard.
        amax = jnp.max(x, axis=-1, keepdims=True)
        x = x * pl.reciprocal(amax, approx=True)              # EUP slot, ~free
    mean = jnp.mean(x, axis=-1, keepdims=True)
    xc = x - mean
    var = jnp.mean(xc * xc, axis=-1, keepdims=True)           # unbiased=False
    scale = lax.rsqrt(var + eps) * g_ref[...].astype(jnp.float32)
    o_ref[...] = (xc * scale).astype(o_ref.dtype)


def layer_norm(x, g, *, stable=False, dim=-1):
    """Pallas implementation of imagenunet LayerNorm.forward (dim=-1)."""
    assert dim == -1, "this kernel implements the default dim=-1 case"
    orig_shape = x.shape
    feats = orig_shape[-1]
    assert g.shape == (feats,)

    eps = 1e-05 if x.dtype == jnp.float32 else 1e-03

    rows = 1
    for s in orig_shape[:-1]:
        rows *= s
    x2d = x.reshape(rows, feats)
    itemsize = x.dtype.itemsize

    compiler_params = pltpu.CompilerParams(
        dimension_semantics=("parallel",),
        vmem_limit_bytes=_VMEM_LIMIT_BYTES,
    )

    # Lane-dense fast path only needs a per-segment *sum* (done on the MXU);
    # stable=True additionally needs a per-segment max, so it stays row-wise.
    use_grouped = (not stable) and feats < _LANES and _LANES % feats == 0

    if use_grouped:
        group = _LANES // feats
        gf = _LANES
        rows_g = pl.cdiv(rows, group)
        tile_r, rows_g_padded = _choose_tile_rows(rows_g, gf * itemsize)
        pad_rows = rows_g_padded * group
        if pad_rows != rows:
            x2d = jnp.pad(x2d, ((0, pad_rows - rows), (0, 0)))
        xg = x2d.reshape(rows_g_padded, gf)          # free row-major regrouping

        # g tiled across the packed segments: lane l uses g[l % feats].
        gg = jnp.tile(g.astype(jnp.float32), group).reshape(1, gf)
        # Block-diagonal averaging matrix (exact in f32: feats is a power of 2).
        seg = (jnp.arange(gf, dtype=jnp.int32) // feats)
        p = (seg[:, None] == seg[None, :]).astype(jnp.float32) / float(feats)

        grid = (rows_g_padded // tile_r,)
        kernel = functools.partial(_layernorm_lane_dense_kernel, eps=eps)
        outg = pl.pallas_call(
            kernel,
            out_shape=jax.ShapeDtypeStruct((rows_g_padded, gf), x.dtype),
            grid_spec=pltpu.PrefetchScalarGridSpec(
                num_scalar_prefetch=0,
                grid=grid,
                in_specs=[
                    pl.BlockSpec((tile_r, gf), lambda i: (i, 0)),
                    pl.BlockSpec((1, gf), lambda i: (0, 0)),
                    pl.BlockSpec((gf, gf), lambda i: (0, 0)),
                ],
                out_specs=pl.BlockSpec((tile_r, gf), lambda i: (i, 0)),
            ),
            compiler_params=compiler_params,
        )(xg, gg, p)
        out2d = outg.reshape(pad_rows, feats)[:rows]
    else:
        # TODO(synk): for very large `feats`, add a second ("arbitrary") grid axis
        # over feats with running sum / sum-of-squares accumulators so a single
        # block never has to hold a whole row (v7x has only 64 MiB VMEM).
        tile_r, rows_padded = _choose_tile_rows(rows, feats * itemsize)
        if rows_padded != rows:
            x2d = jnp.pad(x2d, ((0, rows_padded - rows), (0, 0)))
        g2d = g.astype(jnp.float32).reshape(1, feats)

        grid = (rows_padded // tile_r,)
        kernel = functools.partial(_layernorm_rowwise_kernel, stable=stable, eps=eps)
        outp = pl.pallas_call(
            kernel,
            out_shape=jax.ShapeDtypeStruct((rows_padded, feats), x.dtype),
            grid_spec=pltpu.PrefetchScalarGridSpec(
                num_scalar_prefetch=0,
                grid=grid,
                in_specs=[
                    pl.BlockSpec((tile_r, feats), lambda i: (i, 0)),
                    pl.BlockSpec((1, feats), lambda i: (0, 0)),
                ],
                out_specs=pl.BlockSpec((tile_r, feats), lambda i: (i, 0)),
            ),
            compiler_params=compiler_params,
        )(x2d, g2d)
        out2d = outp[:rows]

    return out2d.reshape(orig_shape)


def layer_norm_ref(x, g, *, stable=False, dim=-1):
    """Pure-JAX reference mirroring the PyTorch forward."""
    xf = x.astype(jnp.float32)
    if stable:
        xf = xf / jnp.max(xf, axis=dim, keepdims=True)
    eps = 1e-05 if x.dtype == jnp.float32 else 1e-03
    mean = jnp.mean(xf, axis=dim, keepdims=True)
    var = jnp.mean((xf - mean) ** 2, axis=dim, keepdims=True)
    return ((xf - mean) * lax.rsqrt(var + eps) * g.astype(jnp.float32)).astype(x.dtype)


if __name__ == "__main__":
    key = jax.random.PRNGKey(0)
    # Input consistent with the module: normalize over the last axis (feats=16).
    B, C, H, W = 2, 4, 16, 16
    x = jax.random.normal(key, (B, C, H, W), dtype=jnp.float32)
    feats = W
    # Parameter init per module __init__: g = ones(feats) for dim=-1.
    g = jnp.ones((feats,), dtype=jnp.float32)

    out = jax.block_until_ready(layer_norm(x, g, stable=False, dim=-1))
    out_stable = jax.block_until_ready(layer_norm(x, g, stable=True, dim=-1))

    ref = layer_norm_ref(x, g, stable=False, dim=-1)
    ref_stable = layer_norm_ref(x, g, stable=True, dim=-1)

    assert out.shape == x.shape and out.dtype == x.dtype
    assert jnp.allclose(out, ref, atol=1e-5, rtol=1e-5)
    assert jnp.allclose(out_stable, ref_stable, atol=1e-5, rtol=1e-5)

    # Odd row count (3*5*7 = 105 rows) exercises the wrapper-side padding path.
    x2 = jax.random.normal(jax.random.PRNGKey(1), (3, 5, 7, feats), dtype=jnp.float32)
    out2 = jax.block_until_ready(layer_norm(x2, g, stable=False, dim=-1))
    ref2 = layer_norm_ref(x2, g, stable=False, dim=-1)
    assert jnp.allclose(out2, ref2, atol=1e-5, rtol=1e-5)

    print("KERNEL_OK")
</pallas_src>

<mosaic_0001>
module attributes {stable_mosaic.version = 11 : i64} {
  func.func @_layernorm_lane_dense_kernel(%arg0: i32, %arg1: memref<16x128xf32, #tpu.memory_space<vmem>>, %arg2: memref<1x128xf32, #tpu.memory_space<vmem>>, %arg3: memref<128x128xf32, #tpu.memory_space<vmem>>, %arg4: memref<16x128xf32, #tpu.memory_space<vmem>>) attributes {dimension_semantics = [#tpu.dimension_semantics<parallel>], iteration_bounds = array<i64: 1>, scalar_prefetch = 0 : i64, scratch_operands = 0 : i64, tpu.core_type = #tpu.core_type<tc>, window_params = [{transform_indices = @transform_0, window_bounds = array<i64: 16, 128>}, {pipeline_mode = #tpu.pipeline_mode<synchronous>, transform_indices = @transform_1, window_bounds = array<i64: 1, 128>}, {pipeline_mode = #tpu.pipeline_mode<synchronous>, transform_indices = @transform_2, window_bounds = array<i64: 128, 128>}, {transform_indices = @transform_3, window_bounds = array<i64: 16, 128>}]} {
    %c0 = arith.constant 0 : index
    %c0_0 = arith.constant 0 : index
    %0 = vector.load %arg1[%c0, %c0_0] : memref<16x128xf32, #tpu.memory_space<vmem>>, vector<16x128xf32>
    %c0_1 = arith.constant 0 : index
    %c0_2 = arith.constant 0 : index
    %1 = vector.load %arg3[%c0_1, %c0_2] : memref<128x128xf32, #tpu.memory_space<vmem>>, vector<128x128xf32>
    %cst = arith.constant dense<0.000000e+00> : vector<16x128xf32>
    %2 = tpu.matmul %0, %1, %cst {dimension_numbers = #tpu.dot_dimension_numbers<[1], [0], [0], [1], [0, 0, 1, 1], [], []>} : vector<16x128xf32>, vector<128x128xf32>, vector<16x128xf32> -> vector<16x128xf32>
    %3 = arith.subf %0, %2 : vector<16x128xf32>
    %4 = arith.mulf %3, %3 : vector<16x128xf32>
    %cst_3 = arith.constant dense<0.000000e+00> : vector<16x128xf32>
    %5 = tpu.matmul %4, %1, %cst_3 {dimension_numbers = #tpu.dot_dimension_numbers<[1], [0], [0], [1], [0, 0, 1, 1], [], []>} : vector<16x128xf32>, vector<128x128xf32>, vector<16x128xf32> -> vector<16x128xf32>
    %cst_4 = arith.constant 9.99999974E-6 : f32
    %6 = vector.broadcast %cst_4 : f32 to vector<16x128xf32>
    %7 = arith.addf %5, %6 : vector<16x128xf32>
    %8 = math.rsqrt %7 : vector<16x128xf32>
    %c0_5 = arith.constant 0 : index
    %c0_6 = arith.constant 0 : index
    %9 = vector.load %arg2[%c0_5, %c0_6] : memref<1x128xf32, #tpu.memory_space<vmem>>, vector<1x128xf32>
    %10 = vector.broadcast %9 : vector<1x128xf32> to vector<16x128xf32>
    %11 = arith.mulf %8, %10 : vector<16x128xf32>
    %12 = arith.mulf %3, %11 : vector<16x128xf32>
    %c0_7 = arith.constant 0 : index
    %c0_8 = arith.constant 0 : index
    %13 = vector.load %arg4[%c0_7, %c0_8] : memref<16x128xf32, #tpu.memory_space<vmem>>, vector<16x128xf32>
    tpu.vector_store %arg4[%c0_7, %c0_8], %12 {strides = array<i32>} : memref<16x128xf32, #tpu.memory_space<vmem>>, vector<16x128xf32>,
    return
  }
  func.func @transform_0(%arg0: i32) -> (i32, i32) {
    %c0_i32 = arith.constant 0 : i32
    %c0_i32_0 = arith.constant 0 : i32
    return %arg0, %c0_i32 : i32, i32
  }
  func.func @transform_1(%arg0: i32) -> (i32, i32) {
    %c0_i32 = arith.constant 0 : i32
    %c0_i32_0 = arith.constant 0 : i32
    %c0_i32_1 = arith.constant 0 : i32
    return %c0_i32, %c0_i32_0 : i32, i32
  }
  func.func @transform_2(%arg0: i32) -> (i32, i32) {
    %c0_i32 = arith.constant 0 : i32
    %c0_i32_0 = arith.constant 0 : i32
    %c0_i32_1 = arith.constant 0 : i32
    return %c0_i32, %c0_i32_0 : i32, i32
  }
  func.func @transform_3(%arg0: i32) -> (i32, i32) {
    %c0_i32 = arith.constant 0 : i32
    %c0_i32_0 = arith.constant 0 : i32
    return %arg0, %c0_i32 : i32, i32
  }
}

</mosaic_0001>

<bundles_post_ra>
// kernel: tpu_custom_call.1
= control target key start
LH: loop header
LB: loop body
LE: loop exit
PB: predicated region body
PF: predicated region fallthrough
CT: control target
= control target key end

     0   :  { %8 = vsyncpa [#allocation3], 0  ;;  %s573_s0 = inlined_call_operand.hbm [shape: f32[16,128], index: 0, kind: input, shape index: {}]   ;;  %s574_s1 = inlined_call_operand.vmem [shape: f32[1,128], index: 1, kind: input, shape index: {}]   ;;  %s575_s2 = inlined_call_operand.hbm [shape: f32[128,128], index: 2, kind: input, shape index: {}]   ;;  %s576_s3 = inlined_call_operand.hbm [shape: f32[16,128], index: 3, kind: output, shape index: {}]  }
   0x1   :  { %9 = vsyncpa [#allocation6], 0 }
   0x2   :  { %10 = vsyncpa [#allocation4], 0  ;;  %s500_s12 = smov [#allocation2]   ;;  %s428_s16 = scalar_lea.hbm %s573_s0, 256 }
   0x3   :  { %s16_s13 = sshll.u32 %s500_s12, 4  ;;  %p429_p0 = scmp.ne.s32.totalorder %s573_s0, %s428_s16  ;;  %s17_s13 = int_to_ptr.vmem [resolvable:$true] %s16_s13 }
   0x4   :  { %p432_p1 = scmp.lt.u32.totalorder %s428_s16, %s573_s0 }
   0x6   :  { %p434_p2 = pnand %p432_p1, %p429_p0 }
   0x8   :  { %437 = shalt.err (!%p434_p2)
}
   0x9   :  { %s438_s21 = scalar_lea.vmem %s17_s13, 256  ;;  %p443_p4 = scmp.lt.s32.totalorder %s17_s13, %s17_s13 }
   0xa   :  { %p439_p3 = scmp.ne.s32.totalorder %s17_s13, %s438_s21  ;;  %p444_p5 = scmp.lt.s32.totalorder %s438_s21, %s438_s21 }
   0xc   :  { %p445_p6 = por %p444_p5, %p443_p4 }
   0xe   :  { %p446_p7 = pnand %p445_p6, %p439_p3 }
  0x10   :  { %449 = shalt.err (!%p446_p7)
}
  0x11   :  { %s501_s22 = smov 128   ;;  %s502_s23 = smov 8  }
  0x12   :  { %22 = dma.hbm_to_vmem [thread:$0]  %s573_s0, 256, %s17_s13, [#allocation3], %s501_s22, %s501_s22, %s502_s23  }
  0x13   :  { %s503_s26 = smov [#allocation5]   ;;  %s450_s30 = scalar_lea.hbm %s575_s2, 2048 }
  0x14   :  { %s30_s27 = sshll.u32 %s503_s26, 4  ;;  %p451_p8 = scmp.ne.s32.totalorder %s575_s2, %s450_s30  ;;  %s31_s27 = int_to_ptr.vmem [resolvable:$true] %s30_s27 }
  0x15   :  { %p454_p9 = scmp.lt.u32.totalorder %s450_s30, %s575_s2 }
  0x17   :  { %p456_p10 = pnand %p454_p9, %p451_p8 }
  0x19   :  { %459 = shalt.err (!%p456_p10)
}
  0x1a   :  { %s460_s8 = scalar_lea.vmem %s31_s27, 2048  ;;  %p465_p12 = scmp.lt.s32.totalorder %s31_s27, %s31_s27 }
  0x1b   :  { %p461_p11 = scmp.ne.s32.totalorder %s31_s27, %s460_s8  ;;  %p466_p13 = scmp.lt.s32.totalorder %s460_s8, %s460_s8 }
  0x1d   :  { %p467_p0 = por %p466_p13, %p465_p12 }
  0x1f   :  { %p468_p1 = pnand %p467_p0, %p461_p11 }
  0x21   :  { %471 = shalt.err (!%p468_p1)
}
  0x22   :  { %36 = dma.hbm_to_vmem [thread:$0]  %s575_s2, 2048, %s31_s27, [#allocation6], %s501_s22, %s501_s22, %s502_s23  }
  0x23   :  { %494 = dma.done.wait [#allocation3], 256  }
  0x24   :  { %495 = vsyncadd [#allocation3], 4294967040 }
  0x25   :  { %496 = dma.done.wait [#allocation6], 2048  }
  0x26   :  { %497 = vsyncadd [#allocation6], 4294965248  ;;  %v45_v0 = vld [vmem:[#allocation5] sm:$0xff]  ;;  %v46_v1 = vld [vmem:[#allocation5 + $0x8] sm:$0xff]  ;;  %s504_s11 = smov [#allocation7]  }
  0x27   :  { %v47_v2 = vld [vmem:[#allocation5 + $0x10] sm:$0xff]  ;;  %v355_v3 = vpack.c.bf16 %v46_v1, %v45_v0  ;;  %v48_v4 = vld [vmem:[#allocation5 + $0x18] sm:$0xff]  ;;  %v49_v6 = vld [vmem:[#allocation5 + $0x20] sm:$0xff]  ;;  %s235_s12 = sshll.u32 %s504_s11, 4  ;;  %s236_s12 = int_to_ptr.vmem [resolvable:$true] %s235_s12 }
  0x28   :  { %v359_v5 = vpack.c.bf16 %v48_v4, %v47_v2  ;;  %v50_v7 = vld [vmem:[#allocation5 + $0x28] sm:$0xff]  ;;  %v43_v9 = vld [vmem:[#allocation2] sm:$0xff]  ;;  %v52_v11 = vld [vmem:[#allocation5 + $0x38] sm:$0xff]  ;;  %s472_s13 = scalar_lea.vmem %s236_s12, 256  ;;  %p477_p3 = scmp.lt.s32.totalorder %s236_s12, %s236_s12 }
  0x29   :  { %356 = vmatprep.subr.bf16.mxu0 %v355_v3  ;;  %388 = vmatprep.subr.bf16.mxu1 %v355_v3  ;;  %v363_v8 = vpack.c.bf16 %v50_v7, %v49_v6  ;;  %v51_v10 = vld [vmem:[#allocation5 + $0x30] sm:$0xff]  ;;  %v53_v13 = vld [vmem:[#allocation5 + $0x40] sm:$0xff]  ;;  %v54_v14 = vld [vmem:[#allocation5 + $0x48] sm:$0xff]  ;;  %p473_p2 = scmp.ne.s32.totalorder %s236_s12, %s472_s13  ;;  %p478_p4 = scmp.lt.s32.totalorder %s472_s13, %s472_s13 }
  0x2a   :  { %358 = vmatpush3.bf16.msra.mxu0 %v355_v3  ;;  %390 = vmatpush3.bf16.msra.mxu1 %v355_v3  ;;  %v367_v12 = vpack.c.bf16 %v52_v11, %v51_v10  ;;  %v371_v15 = vpack.c.bf16 %v54_v14, %v53_v13  ;;  %v55_v16 = vld [vmem:[#allocation5 + $0x50] sm:$0xff]  ;;  %v56_v17 = vld [vmem:[#allocation5 + $0x58] sm:$0xff]  ;;  %v57_v19 = vld [vmem:[#allocation5 + $0x60] sm:$0xff] }
  0x2b   :  { %360 = vmatprep.subr.bf16.mxu0 %v359_v5  ;;  %392 = vmatprep.subr.bf16.mxu1 %v359_v5  ;;  %v375_v18 = vpack.c.bf16 %v56_v17, %v55_v16  ;;  %v58_v20 = vld [vmem:[#allocation5 + $0x68] sm:$0xff]  ;;  %v59_v22 = vld [vmem:[#allocation5 + $0x70] sm:$0xff]  ;;  %v60_v23 = vld [vmem:[#allocation5 + $0x78] sm:$0xff]  ;;  %p479_p5 = por %p478_p4, %p477_p3 }
  0x2c   :  { %317 = vmatprep.mubr.f32.mxu0 %v43_v9  ;;  %v379_v21 = vpack.c.bf16 %v58_v20, %v57_v19  ;;  %v383_v24 = vpack.c.bf16 %v60_v23, %v59_v22  ;;  %v44_v25 = vld [vmem:[#allocation2 + $0x8] sm:$0xff]  ;;  %v248_v36 = vld [vmem:[%s574_s1] ss:$0 sm:$0xff] }
  0x2d   :  { %p480_p6 = pnand %p479_p5, %p473_p2 }
  0x2e   :  { %362 = vmatpush3.bf16.msra.mxu0 %v359_v5  ;;  %394 = vmatpush3.bf16.msra.mxu1 %v359_v5 }
  0x2f   :  { %364 = vmatprep.subr.bf16.mxu0 %v363_v8  ;;  %396 = vmatprep.subr.bf16.mxu1 %v363_v8 }
  0x32   :  { %366 = vmatpush3.bf16.msra.mxu0 %v363_v8  ;;  %398 = vmatpush3.bf16.msra.mxu1 %v363_v8 }
  0x33   :  { %368 = vmatprep.subr.bf16.mxu0 %v367_v12  ;;  %400 = vmatprep.subr.bf16.mxu1 %v367_v12 }
  0x36   :  { %370 = vmatpush3.bf16.msra.mxu0 %v367_v12  ;;  %402 = vmatpush3.bf16.msra.mxu1 %v367_v12 }
  0x37   :  { %372 = vmatprep.subr.bf16.mxu0 %v371_v15  ;;  %404 = vmatprep.subr.bf16.mxu1 %v371_v15 }
  0x3a   :  { %374 = vmatpush3.bf16.msra.mxu0 %v371_v15  ;;  %406 = vmatpush3.bf16.msra.mxu1 %v371_v15 }
  0x3b   :  { %376 = vmatprep.subr.bf16.mxu0 %v375_v18  ;;  %408 = vmatprep.subr.bf16.mxu1 %v375_v18 }
  0x3e   :  { %378 = vmatpush3.bf16.msra.mxu0 %v375_v18  ;;  %410 = vmatpush3.bf16.msra.mxu1 %v375_v18 }
  0x3f   :  { %380 = vmatprep.subr.bf16.mxu0 %v379_v21  ;;  %412 = vmatprep.subr.bf16.mxu1 %v379_v21 }
  0x42   :  { %382 = vmatpush3.bf16.msra.mxu0 %v379_v21  ;;  %414 = vmatpush3.bf16.msra.mxu1 %v379_v21 }
  0x43   :  { %384 = vmatprep.subr.bf16.mxu0 %v383_v24  ;;  %416 = vmatprep.subr.bf16.mxu1 %v383_v24 }
  0x46   :  { %386 = vmatpush3.bf16.msra.mxu0 %v383_v24  ;;  %418 = vmatpush3.bf16.msra.mxu1 %v383_v24 }
  0x49   :  { %318 = vmatmul.mubr.f32.vlgmr.msra.gmra.mrb[0].mxu0 %v44_v25 }
 0x11c   :  { %v319_v26 = vpop.f32.mrb[0].mxu0 }
 0x11d   :  { %v137_v27 = vsub.f32 %v44_v25, %v319_v26  ;;  %v127_v28 = vpop.f32.mrb[1].mxu0 }
 0x11e   :  { %v136_v29 = vsub.f32 %v43_v9, %v127_v28 }
 0x11f   :  { %v139_v31 = vmul.f32 %v137_v27, %v137_v27 }
 0x120   :  { %v138_v30 = vmul.f32 %v136_v29, %v136_v29 }
 0x122   :  { %352 = vmatprep.mubr.f32.mxu1 %v138_v30 }
 0x123   :  { %353 = vmatmul.mubr.f32.vlgmr.msra.gmra.mrb[0].mxu1 %v139_v31 }
 0x1f6   :  { %v354_v32 = vpop.f32.mrb[0].mxu1 }
 0x1f7   :  { %v212_v33 = vadd.f32 1e-05, %v354_v32  ;;  %v206_v34 = vpop.f32.mrb[1].mxu1 }
 0x1f8   :  { %v207_v35 = vadd.f32 1e-05, %v206_v34 }
 0x1f9   :  { %424 = vrsqrt.f32 %v212_v33 }
 0x1fa   :  { %426 = vrsqrt.f32 %v207_v35 }
 0x203   :  { %v425_v37 = vpop.eup %424 }
 0x204   :  { %v427_v38 = vpop.eup %426  ;;  %v225_v39 = vmul.f32 %v425_v37, %v248_v36 }
 0x205   :  { %v224_v40 = vmul.f32 %v427_v38, %v248_v36 }
 0x206   :  { %v227_v41 = vmul.f32 %v225_v39, %v137_v27 }
 0x207   :  { %v226_v42 = vmul.f32 %v224_v40, %v136_v29 }
 0x208   :  { %229 = vst [vmem:[#allocation7 + $0x8] sm:$0xff] %v227_v41 }
 0x209   :  { %228 = vst [vmem:[#allocation7] sm:$0xff] %v226_v42 }
 0x20a   :  { %483 = shalt.err (!%p480_p6)
}
 0x20b   :  { %s484_s15 = scalar_lea.hbm %s576_s3, 256 }
 0x20c   :  { %p485_p7 = scmp.ne.s32.totalorder %s576_s3, %s484_s15  ;;  %p488_p8 = scmp.lt.u32.totalorder %s484_s15, %s576_s3 }
 0x20e   :  { %p490_p9 = pnand %p488_p8, %p485_p7 }
 0x210   :  { %493 = shalt.err (!%p490_p9)
}
 0x211   :  { %241 = dma.vmem_to_hbm [thread:$0]  %s236_s12, 256, %s576_s3, [#allocation4], %s501_s22, %s501_s22, %s502_s23  }
 0x212   :  { %498 = dma.done.wait [#allocation4], 256  }
 0x213   :  { %499 = vsyncadd [#allocation4], 4294967040 }
 0x214   :  { %245 = vsyncpa [#allocation3], 1 }
 0x215   :  { %246 = vsyncpa [#allocation6], 1 }
 0x216   :  { %247 = vsyncpa [#allocation4], 1 }

</bundles_post_ra>
